<compile_context>
chip_gen: v6e
topology: v6e:2x2x1
jax: 0.10.0
libtpu: 0.0.40
codegen_flags: <defaults>
</compile_context>

<pallas_src>
import numpy as np
import jax
import jax.numpy as jnp
from jax import lax
from jax.experimental import pallas as pl
from jax.experimental.pallas import tpu as pltpu


def _round_up(x, m):
    return (x + m - 1) // m * m


def _vmem_capacity_bytes():
    try:
        return int(pltpu.get_tpu_info().vmem_capacity_bytes)
    except Exception:
        return 64 * 1024 * 1024  # conservative default (v7x physical VMEM)


def _build_vacf_call(t_range, t_pad, f_tile, n_f, tr_lanes, unroll, vmem_limit_bytes):
    """pallas_call computing raw (unnormalized) lag sums per feature tile."""

    def kernel(vel_ref, out_ref):
        # vel_ref: (t_pad, f_tile) f32; rows >= T and lanes past the true feature
        #          count are zero, so out-of-window products vanish.
        # out_ref: (1, 1, tr_lanes) f32 -- lane-dense row of raw lag sums.
        base = vel_ref[...]                                        # (t_pad, f_tile)
        lane_ids = lax.broadcasted_iota(jnp.int32, (1, tr_lanes), 1)   # hoisted

        def body(t, carry):
            shifted, acc = carry
            prod = base * shifted                                  # VPU elementwise
            col = jnp.sum(prod, axis=1, keepdims=True)             # XLU lane reduce (exact f32)
            s = jnp.sum(col, axis=0, keepdims=True)                # sublane reduce -> (1, 1)
            acc = acc + jnp.where(lane_ids == t, s, 0.0)           # vreg-resident lane update
            # Advance the lag window by one step along the zero-padded time axis.
            # Pure sublane rotate (XLU) -- no unaligned sublane slice, no re-layout.
            # Either rotate direction is correct: wrapped rows hit the >= t_range
            # zero-pad rows of `base`, so they never contribute.
            shifted = pltpu.roll(shifted, shift=1, axis=0)
            return shifted, acc

        acc0 = jnp.zeros((1, tr_lanes), jnp.float32)
        _, acc = lax.fori_loop(0, t_range, body, (base, acc0), unroll=unroll)
        out_ref[0] = acc                                           # single lane-dense store

    return pl.pallas_call(
        kernel,
        out_shape=jax.ShapeDtypeStruct((n_f, 1, tr_lanes), jnp.float32),
        grid_spec=pltpu.PrefetchScalarGridSpec(
            num_scalar_prefetch=0,
            grid=(n_f,),
            in_specs=[pl.BlockSpec((t_pad, f_tile), lambda j: (0, j))],
            out_specs=pl.BlockSpec((1, 1, tr_lanes), lambda j: (j, 0, 0)),
        ),
        compiler_params=pltpu.CompilerParams(
            # Feature tiles are independent (each writes its own output row), so the
            # axis is "parallel": v7x can shard tiles across its 2 TensorCores.
            dimension_semantics=("parallel",),
            vmem_limit_bytes=vmem_limit_bytes,
        ),
    )


def vacf_forward(vel, t_range):
    """vel: (T, N, D) array. Returns (t_range,) float32 matching the torch module."""
    T, N, D = vel.shape
    F = N * D
    assert 1 <= t_range <= T, "vacf requires 1 <= t_range <= number of timesteps"

    # Keep f32 end-to-end for an exact match with the f32 torch.mean reference.
    flat = vel.reshape(T, F).astype(jnp.float32)

    # Time axis: pad with at least (t_range - 1) zero rows so the incremental
    # sublane rotate never wraps real data back into the correlation window.
    t_pad = _round_up(T + t_range, 8)
    tr_lanes = _round_up(t_range, 128)            # lane-dense output width

    # Feature (lane) tiling, sized from the chip's real VMEM capacity.
    vmem_cap = _vmem_capacity_bytes()
    in_budget = vmem_cap // 6                      # budget for the double-buffered input block
    F128 = _round_up(F, 128)
    n_lane_tiles = F128 // 128
    budget_tiles = max(1, in_budget // (2 * 4 * t_pad * 128))
    f_tile_tiles = max(1, min(n_lane_tiles, budget_tiles))
    if n_lane_tiles >= 2:
        # Guarantee >= 2 feature blocks so both v7x TensorCores get work.
        f_tile_tiles = min(f_tile_tiles, pl.cdiv(n_lane_tiles, 2))
    f_tile = f_tile_tiles * 128
    n_f = pl.cdiv(F128, f_tile)
    f_pad = n_f * f_tile

    padded = jnp.zeros((t_pad, f_pad), dtype=jnp.float32).at[:T, :F].set(flat)

    # ~2x input double-buffer + shifted carry + product temp + output, with headroom.
    block_bytes = 4 * t_pad * f_tile
    vmem_limit = int(min(min(int(0.9 * vmem_cap), 100 * 1024 * 1024),
                         max(16 * 1024 * 1024, 6 * block_bytes)))

    unroll = max(1, min(8, t_range))
    call = _build_vacf_call(t_range, t_pad, f_tile, n_f, tr_lanes, unroll, vmem_limit)
    partial = call(padded)                          # (n_f, 1, tr_lanes) raw lag sums

    raw = jnp.sum(partial[:, 0, :t_range], axis=0)  # (t_range,) total lag sums
    # Exact per-lag element counts; reciprocal in float64 on host, applied in f32.
    counts = (float(T) - np.arange(t_range, dtype=np.float64)) * float(F)
    return raw * jnp.asarray(1.0 / counts, dtype=jnp.float32)


def vacf_reference(vel, t_range):
    vel = vel.astype(jnp.float32)
    parts = [jnp.mean(vel * vel)[None]]
    parts += [jnp.mean(vel[t:] * vel[:-t])[None] for t in range(1, t_range)]
    return jnp.concatenate(parts, axis=0)


if __name__ == "__main__":
    key = jax.random.PRNGKey(0)
    T, N, D = 16, 8, 3          # timesteps, atoms, spatial dims
    t_range = 8                 # vacf lags 0..7

    vel = jax.random.normal(key, (T, N, D), dtype=jnp.float32)

    out = jax.block_until_ready(vacf_forward(vel, t_range))
    ref = vacf_reference(vel, t_range)

    assert out.shape == (t_range,)
    assert jnp.allclose(out, ref, rtol=1e-5, atol=1e-5), (out, ref)

    print("KERNEL_OK")
</pallas_src>

<mosaic_0001>
module attributes {stable_mosaic.version = 11 : i64} {
  func.func @kernel(%arg0: i32, %arg1: memref<24x128xf32, #tpu.memory_space<vmem>>, %arg2: memref<1x1x128xf32, #tpu.memory_space<vmem>>) attributes {dimension_semantics = [#tpu.dimension_semantics<parallel>], iteration_bounds = array<i64: 1>, scalar_prefetch = 0 : i64, scratch_operands = 0 : i64, tpu.core_type = #tpu.core_type<tc>, window_params = [{transform_indices = @transform_0, window_bounds = array<i64: 24, 128>}, {transform_indices = @transform_1, window_bounds = array<i64: 1, 1, 128>}]} {
    %c0 = arith.constant 0 : index
    %c0_0 = arith.constant 0 : index
    %0 = vector.load %arg1[%c0, %c0_0] : memref<24x128xf32, #tpu.memory_space<vmem>>, vector<24x128xf32>
    %1 = tpu.iota {dimensions = array<i32: 1>} : vector<1x128xi32>
    %cst = arith.constant 0.000000e+00 : f32
    %2 = vector.broadcast %cst : f32 to vector<1x128xf32>
    %c0_i32 = arith.constant 0 : i32
    %3 = arith.mulf %0, %0 : vector<24x128xf32>
    %cst_1 = arith.constant dense<0.000000e+00> : vector<24xf32>
    %4 = vector.multi_reduction <add>, %3, %cst_1 [1] : vector<24x128xf32> to vector<24xf32>
    %5 = vector.shape_cast %4 : vector<24xf32> to vector<24x1xf32>
    %cst_2 = arith.constant dense<0.000000e+00> : vector<1xf32>
    %6 = vector.multi_reduction <add>, %5, %cst_2 [0] : vector<24x1xf32> to vector<1xf32>
    %7 = vector.shape_cast %6 : vector<1xf32> to vector<1x1xf32>
    %8 = vector.broadcast %c0_i32 : i32 to vector<1x128xi32>
    %9 = arith.cmpi eq, %1, %8 : vector<1x128xi32>
    %cst_3 = arith.constant 0.000000e+00 : f32
    %10 = vector.shape_cast %7 : vector<1x1xf32> to vector<1x1xf32>
    %11 = vector.broadcast %10 : vector<1x1xf32> to vector<1x128xf32>
    %12 = vector.broadcast %cst_3 : f32 to vector<1x128xf32>
    %13 = arith.select %9, %11, %12 : vector<1x128xi1>, vector<1x128xf32>
    %14 = arith.addf %2, %13 : vector<1x128xf32>
    %c1_i32 = arith.constant 1 : i32
    %15 = tpu.dynamic_rotate %0 by %c1_i32 dim 0 : vector<24x128xf32>, i32 -> vector<24x128xf32>
    %c1_i32_4 = arith.constant 1 : i32
    %16 = arith.mulf %0, %15 : vector<24x128xf32>
    %cst_5 = arith.constant dense<0.000000e+00> : vector<24xf32>
    %17 = vector.multi_reduction <add>, %16, %cst_5 [1] : vector<24x128xf32> to vector<24xf32>
    %18 = vector.shape_cast %17 : vector<24xf32> to vector<24x1xf32>
    %cst_6 = arith.constant dense<0.000000e+00> : vector<1xf32>
    %19 = vector.multi_reduction <add>, %18, %cst_6 [0] : vector<24x1xf32> to vector<1xf32>
    %20 = vector.shape_cast %19 : vector<1xf32> to vector<1x1xf32>
    %21 = vector.broadcast %c1_i32_4 : i32 to vector<1x128xi32>
    %22 = arith.cmpi eq, %1, %21 : vector<1x128xi32>
    %cst_7 = arith.constant 0.000000e+00 : f32
    %23 = vector.shape_cast %20 : vector<1x1xf32> to vector<1x1xf32>
    %24 = vector.broadcast %23 : vector<1x1xf32> to vector<1x128xf32>
    %25 = vector.broadcast %cst_7 : f32 to vector<1x128xf32>
    %26 = arith.select %22, %24, %25 : vector<1x128xi1>, vector<1x128xf32>
    %27 = arith.addf %14, %26 : vector<1x128xf32>
    %c1_i32_8 = arith.constant 1 : i32
    %28 = tpu.dynamic_rotate %15 by %c1_i32_8 dim 0 : vector<24x128xf32>, i32 -> vector<24x128xf32>
    %c2_i32 = arith.constant 2 : i32
    %29 = arith.mulf %0, %28 : vector<24x128xf32>
    %cst_9 = arith.constant dense<0.000000e+00> : vector<24xf32>
    %30 = vector.multi_reduction <add>, %29, %cst_9 [1] : vector<24x128xf32> to vector<24xf32>
    %31 = vector.shape_cast %30 : vector<24xf32> to vector<24x1xf32>
    %cst_10 = arith.constant dense<0.000000e+00> : vector<1xf32>
    %32 = vector.multi_reduction <add>, %31, %cst_10 [0] : vector<24x1xf32> to vector<1xf32>
    %33 = vector.shape_cast %32 : vector<1xf32> to vector<1x1xf32>
    %34 = vector.broadcast %c2_i32 : i32 to vector<1x128xi32>
    %35 = arith.cmpi eq, %1, %34 : vector<1x128xi32>
    %cst_11 = arith.constant 0.000000e+00 : f32
    %36 = vector.shape_cast %33 : vector<1x1xf32> to vector<1x1xf32>
    %37 = vector.broadcast %36 : vector<1x1xf32> to vector<1x128xf32>
    %38 = vector.broadcast %cst_11 : f32 to vector<1x128xf32>
    %39 = arith.select %35, %37, %38 : vector<1x128xi1>, vector<1x128xf32>
    %40 = arith.addf %27, %39 : vector<1x128xf32>
    %c1_i32_12 = arith.constant 1 : i32
    %41 = tpu.dynamic_rotate %28 by %c1_i32_12 dim 0 : vector<24x128xf32>, i32 -> vector<24x128xf32>
    %c3_i32 = arith.constant 3 : i32
    %42 = arith.mulf %0, %41 : vector<24x128xf32>
    %cst_13 = arith.constant dense<0.000000e+00> : vector<24xf32>
    %43 = vector.multi_reduction <add>, %42, %cst_13 [1] : vector<24x128xf32> to vector<24xf32>
    %44 = vector.shape_cast %43 : vector<24xf32> to vector<24x1xf32>
    %cst_14 = arith.constant dense<0.000000e+00> : vector<1xf32>
    %45 = vector.multi_reduction <add>, %44, %cst_14 [0] : vector<24x1xf32> to vector<1xf32>
    %46 = vector.shape_cast %45 : vector<1xf32> to vector<1x1xf32>
    %47 = vector.broadcast %c3_i32 : i32 to vector<1x128xi32>
    %48 = arith.cmpi eq, %1, %47 : vector<1x128xi32>
    %cst_15 = arith.constant 0.000000e+00 : f32
    %49 = vector.shape_cast %46 : vector<1x1xf32> to vector<1x1xf32>
    %50 = vector.broadcast %49 : vector<1x1xf32> to vector<1x128xf32>
    %51 = vector.broadcast %cst_15 : f32 to vector<1x128xf32>
    %52 = arith.select %48, %50, %51 : vector<1x128xi1>, vector<1x128xf32>
    %53 = arith.addf %40, %52 : vector<1x128xf32>
    %c1_i32_16 = arith.constant 1 : i32
    %54 = tpu.dynamic_rotate %41 by %c1_i32_16 dim 0 : vector<24x128xf32>, i32 -> vector<24x128xf32>
    %c4_i32 = arith.constant 4 : i32
    %55 = arith.mulf %0, %54 : vector<24x128xf32>
    %cst_17 = arith.constant dense<0.000000e+00> : vector<24xf32>
    %56 = vector.multi_reduction <add>, %55, %cst_17 [1] : vector<24x128xf32> to vector<24xf32>
    %57 = vector.shape_cast %56 : vector<24xf32> to vector<24x1xf32>
    %cst_18 = arith.constant dense<0.000000e+00> : vector<1xf32>
    %58 = vector.multi_reduction <add>, %57, %cst_18 [0] : vector<24x1xf32> to vector<1xf32>
    %59 = vector.shape_cast %58 : vector<1xf32> to vector<1x1xf32>
    %60 = vector.broadcast %c4_i32 : i32 to vector<1x128xi32>
    %61 = arith.cmpi eq, %1, %60 : vector<1x128xi32>
    %cst_19 = arith.constant 0.000000e+00 : f32
    %62 = vector.shape_cast %59 : vector<1x1xf32> to vector<1x1xf32>
    %63 = vector.broadcast %62 : vector<1x1xf32> to vector<1x128xf32>
    %64 = vector.broadcast %cst_19 : f32 to vector<1x128xf32>
    %65 = arith.select %61, %63, %64 : vector<1x128xi1>, vector<1x128xf32>
    %66 = arith.addf %53, %65 : vector<1x128xf32>
    %c1_i32_20 = arith.constant 1 : i32
    %67 = tpu.dynamic_rotate %54 by %c1_i32_20 dim 0 : vector<24x128xf32>, i32 -> vector<24x128xf32>
    %c5_i32 = arith.constant 5 : i32
    %68 = arith.mulf %0, %67 : vector<24x128xf32>
    %cst_21 = arith.constant dense<0.000000e+00> : vector<24xf32>
    %69 = vector.multi_reduction <add>, %68, %cst_21 [1] : vector<24x128xf32> to vector<24xf32>
    %70 = vector.shape_cast %69 : vector<24xf32> to vector<24x1xf32>
    %cst_22 = arith.constant dense<0.000000e+00> : vector<1xf32>
    %71 = vector.multi_reduction <add>, %70, %cst_22 [0] : vector<24x1xf32> to vector<1xf32>
    %72 = vector.shape_cast %71 : vector<1xf32> to vector<1x1xf32>
    %73 = vector.broadcast %c5_i32 : i32 to vector<1x128xi32>
    %74 = arith.cmpi eq, %1, %73 : vector<1x128xi32>
    %cst_23 = arith.constant 0.000000e+00 : f32
    %75 = vector.shape_cast %72 : vector<1x1xf32> to vector<1x1xf32>
    %76 = vector.broadcast %75 : vector<1x1xf32> to vector<1x128xf32>
    %77 = vector.broadcast %cst_23 : f32 to vector<1x128xf32>
    %78 = arith.select %74, %76, %77 : vector<1x128xi1>, vector<1x128xf32>
    %79 = arith.addf %66, %78 : vector<1x128xf32>
    %c1_i32_24 = arith.constant 1 : i32
    %80 = tpu.dynamic_rotate %67 by %c1_i32_24 dim 0 : vector<24x128xf32>, i32 -> vector<24x128xf32>
    %c6_i32 = arith.constant 6 : i32
    %81 = arith.mulf %0, %80 : vector<24x128xf32>
    %cst_25 = arith.constant dense<0.000000e+00> : vector<24xf32>
    %82 = vector.multi_reduction <add>, %81, %cst_25 [1] : vector<24x128xf32> to vector<24xf32>
    %83 = vector.shape_cast %82 : vector<24xf32> to vector<24x1xf32>
    %cst_26 = arith.constant dense<0.000000e+00> : vector<1xf32>
    %84 = vector.multi_reduction <add>, %83, %cst_26 [0] : vector<24x1xf32> to vector<1xf32>
    %85 = vector.shape_cast %84 : vector<1xf32> to vector<1x1xf32>
    %86 = vector.broadcast %c6_i32 : i32 to vector<1x128xi32>
    %87 = arith.cmpi eq, %1, %86 : vector<1x128xi32>
    %cst_27 = arith.constant 0.000000e+00 : f32
    %88 = vector.shape_cast %85 : vector<1x1xf32> to vector<1x1xf32>
    %89 = vector.broadcast %88 : vector<1x1xf32> to vector<1x128xf32>
    %90 = vector.broadcast %cst_27 : f32 to vector<1x128xf32>
    %91 = arith.select %87, %89, %90 : vector<1x128xi1>, vector<1x128xf32>
    %92 = arith.addf %79, %91 : vector<1x128xf32>
    %c1_i32_28 = arith.constant 1 : i32
    %93 = tpu.dynamic_rotate %80 by %c1_i32_28 dim 0 : vector<24x128xf32>, i32 -> vector<24x128xf32>
    %c7_i32 = arith.constant 7 : i32
    %94 = arith.mulf %0, %93 : vector<24x128xf32>
    %cst_29 = arith.constant dense<0.000000e+00> : vector<24xf32>
    %95 = vector.multi_reduction <add>, %94, %cst_29 [1] : vector<24x128xf32> to vector<24xf32>
    %96 = vector.shape_cast %95 : vector<24xf32> to vector<24x1xf32>
    %cst_30 = arith.constant dense<0.000000e+00> : vector<1xf32>
    %97 = vector.multi_reduction <add>, %96, %cst_30 [0] : vector<24x1xf32> to vector<1xf32>
    %98 = vector.shape_cast %97 : vector<1xf32> to vector<1x1xf32>
    %99 = vector.broadcast %c7_i32 : i32 to vector<1x128xi32>
    %100 = arith.cmpi eq, %1, %99 : vector<1x128xi32>
    %cst_31 = arith.constant 0.000000e+00 : f32
    %101 = vector.shape_cast %98 : vector<1x1xf32> to vector<1x1xf32>
    %102 = vector.broadcast %101 : vector<1x1xf32> to vector<1x128xf32>
    %103 = vector.broadcast %cst_31 : f32 to vector<1x128xf32>
    %104 = arith.select %100, %102, %103 : vector<1x128xi1>, vector<1x128xf32>
    %105 = arith.addf %92, %104 : vector<1x128xf32>
    %c1_i32_32 = arith.constant 1 : i32
    %106 = tpu.dynamic_rotate %93 by %c1_i32_32 dim 0 : vector<24x128xf32>, i32 -> vector<24x128xf32>
    %c8_i32 = arith.constant 8 : i32
    %c0_33 = arith.constant 0 : index
    %c0_34 = arith.constant 0 : index
    %c0_35 = arith.constant 0 : index
    %107 = vector.load %arg2[%c0_33, %c0_34, %c0_35] : memref<1x1x128xf32, #tpu.memory_space<vmem>>, vector<1x1x128xf32>
    %108 = vector.shape_cast %107 : vector<1x1x128xf32> to vector<1x128xf32>
    %109 = vector.shape_cast %105 : vector<1x128xf32> to vector<1x1x128xf32>
    tpu.vector_store %arg2[%c0_33, %c0_34, %c0_35], %109 {strides = array<i32>} : memref<1x1x128xf32, #tpu.memory_space<vmem>>, vector<1x1x128xf32>,
    return
  }
  func.func @transform_0(%arg0: i32) -> (i32, i32) {
    %c0_i32 = arith.constant 0 : i32
    %c0_i32_0 = arith.constant 0 : i32
    return %c0_i32, %arg0 : i32, i32
  }
  func.func @transform_1(%arg0: i32) -> (i32, i32, i32) {
    %c0_i32 = arith.constant 0 : i32
    %c0_i32_0 = arith.constant 0 : i32
    %c0_i32_1 = arith.constant 0 : i32
    return %arg0, %c0_i32, %c0_i32_0 : i32, i32, i32
  }
}

</mosaic_0001>

<bundles_post_ra>
// kernel: tpu_custom_call.1
= control target key start
LH: loop header
LB: loop body
LE: loop exit
PB: predicated region body
PF: predicated region fallthrough
CT: control target
= control target key end

     0   :  { %6 = vsyncpa [#allocation3], 0  ;;  %s400_s0 = inlined_call_operand.hbm [shape: f32[24,128], index: 0, kind: input, shape index: {}]   ;;  %s401_s1 = inlined_call_operand.hbm [shape: f32[1,1,128], index: 1, kind: output, shape index: {}]  }
   0x1   :  { %7 = vsyncpa [#allocation4], 0  ;;  %s297_s6 = smov [#allocation2]  }
   0x2   :  { %s13_s7 = sshll.u32 %s297_s6, 4  ;;  %s14_s7 = int_to_ptr.vmem [resolvable:$true] %s13_s7 }
   0x3   :  { %s261_s8 = scalar_lea.vmem %s14_s7, 384  ;;  %p266_p1 = scmp.lt.s32.totalorder %s14_s7, %s14_s7 }
   0x4   :  { %p262_p0 = scmp.ne.s32.totalorder %s14_s7, %s261_s8  ;;  %p267_p2 = scmp.lt.s32.totalorder %s261_s8, %s261_s8 }
   0x6   :  { %p268_p3 = por %p267_p2, %p266_p1 }
   0x8   :  { %p269_p4 = pnand %p268_p3, %p262_p0 }
   0xa   :  { %272 = shalt.err (!%p269_p4)
}
   0xb   :  { %s298_s9 = smov 128   ;;  %s299_s10 = smov 8  }
   0xc   :  { %19 = dma.hbm_to_vmem [thread:$0]  %s400_s0, 384, %s14_s7, [#allocation3], %s298_s9, %s298_s9, %s299_s10  }
   0xd   :  { %293 = dma.done.wait [#allocation3], 384  }
   0xe   :  { %294 = vsyncadd [#allocation3], 4294966912  ;;  %v26_v0 = vlaneseq  ;;  %v317_v2 = vld [vmem:[#allocation2] sm:$0xff]  ;;  %v319_v3 = vld [vmem:[#allocation2 + $0x10] sm:$0xff]  ;;  %s300_s0 = smov [#allocation5]  }
   0xf   :  { %v322_v4 = vld [vmem:[#allocation2 + $0x8] sm:$0xff]  ;;  %v28_v5 = vmul.f32 %v317_v2, %v317_v2  ;;  %v48_v6 = vrot.slane %v317_v2, 7  ;;  %v50_v7 = vrot.slane %v319_v3, 7  ;;  %v30_v18 = vmul.f32 %v319_v3, %v319_v3  ;;  %s240_s13 = sshll.u32 %s300_s0, 4  ;;  %s241_s13 = int_to_ptr.vmem [resolvable:$true] %s240_s13 }
  0x10   :  { %v315_v1 = vshrl.u32 %v26_v0, 7  ;;  %v49_v8 = vrot.slane %v322_v4, 7  ;;  %v29_v10 = vmul.f32 %v322_v4, %v322_v4  ;;  %s273_s14 = scalar_lea.vmem %s241_s13, 16  ;;  %s277_s15 = scalar_lea.vmem %s241_s13, 32 }
  0x11   :  { %31 = vadd.xlane.f32.xlu0 %v28_v5  ;;  %p274_p5 = scmp.ne.s32.totalorder %s241_s13, %s273_s14  ;;  %p278_p6 = scmp.lt.s32.totalorder %s241_s13, %s241_s13 }
  0x12   :  { %vm53_vm0 = vcmp.lt.s32.totalorder %v315_v1, 1  ;;  %p279_p7 = scmp.lt.s32.totalorder %s277_s15, %s273_s14 }
  0x13   :  { %v56_v9 = vsel %vm53_vm0, %v50_v7, %v48_v6  ;;  %v55_v13 = vsel %vm53_vm0, %v48_v6, %v49_v8  ;;  %v54_v14 = vsel %vm53_vm0, %v49_v8, %v50_v7 }
  0x14   :  { %v57_v11 = vmul.f32 %v56_v9, %v317_v2  ;;  %v77_v12 = vrot.slane %v56_v9, 7  ;;  %v78_v15 = vrot.slane %v55_v13, 7  ;;  %v79_v16 = vrot.slane %v54_v14, 7  ;;  %p280_p8 = por %p279_p7, %p278_p6 }
  0x15   :  { %v58_v17 = vmul.f32 %v55_v13, %v322_v4  ;;  %33 = vadd.xlane.f32.xlu0 %v29_v10  ;;  %v59_v23 = vmul.f32 %v54_v14, %v319_v3 }
  0x16   :  { %60 = vadd.xlane.f32.xlu1 %v57_v11  ;;  %v82_v19 = vsel %vm53_vm0, %v79_v16, %v77_v12  ;;  %v81_v20 = vsel %vm53_vm0, %v77_v12, %v78_v15  ;;  %v80_v21 = vsel %vm53_vm0, %v78_v15, %v79_v16  ;;  %p281_p9 = pnand %p280_p8, %p274_p5 }
  0x17   :  { %v104_v22 = vrot.slane %v81_v20, 7  ;;  %v83_v24 = vmul.f32 %v82_v19, %v317_v2  ;;  %v103_v25 = vrot.slane %v82_v19, 7  ;;  %v105_v26 = vrot.slane %v80_v21, 7 }
  0x18   :  { %v84_v28 = vmul.f32 %v81_v20, %v322_v4  ;;  %v85_v29 = vmul.f32 %v80_v21, %v319_v3 }
  0x19   :  { %35 = vadd.xlane.f32.xlu0 %v30_v18  ;;  %v106_v27 = vsel %vm53_vm0, %v104_v22, %v105_v26  ;;  %v108_v30 = vsel %vm53_vm0, %v105_v26, %v103_v25  ;;  %v107_v31 = vsel %vm53_vm0, %v103_v25, %v104_v22 }
  0x1a   :  { %62 = vadd.xlane.f32.xlu1 %v58_v17  ;;  %v129_v32 = vrot.slane %v108_v30, 7  ;;  %v130_v33 = vrot.slane %v107_v31, 7  ;;  %v131_v34 = vrot.slane %v106_v27, 7  ;;  %v109_v35 = vmul.f32 %v108_v30, %v317_v2 }
  0x1b   :  { %v110_v36 = vmul.f32 %v107_v31, %v322_v4  ;;  %v111_v41 = vmul.f32 %v106_v27, %v319_v3 }
  0x1c   :  { %v134_v37 = vsel %vm53_vm0, %v131_v34, %v129_v32  ;;  %v133_v38 = vsel %vm53_vm0, %v129_v32, %v130_v33  ;;  %v132_v39 = vsel %vm53_vm0, %v130_v33, %v131_v34 }
  0x1d   :  { %86 = vadd.xlane.f32.xlu0 %v83_v24  ;;  %v156_v40 = vrot.slane %v133_v38, 7  ;;  %v135_v42 = vmul.f32 %v134_v37, %v317_v2  ;;  %v155_v43 = vrot.slane %v134_v37, 7  ;;  %v157_v44 = vrot.slane %v132_v39, 7 }
  0x1e   :  { %64 = vadd.xlane.f32.xlu1 %v59_v23  ;;  %v136_v46 = vmul.f32 %v133_v38, %v322_v4  ;;  %v137_v47 = vmul.f32 %v132_v39, %v319_v3 }
  0x1f   :  { %v158_v45 = vsel %vm53_vm0, %v156_v40, %v157_v44  ;;  %v160_v48 = vsel %vm53_vm0, %v157_v44, %v155_v43  ;;  %v159_v49 = vsel %vm53_vm0, %v155_v43, %v156_v40 }
  0x20   :  { %v181_v50 = vrot.slane %v160_v48, 7  ;;  %v182_v51 = vrot.slane %v159_v49, 7  ;;  %v183_v52 = vrot.slane %v158_v45, 7  ;;  %v161_v53 = vmul.f32 %v160_v48, %v317_v2 }
  0x21   :  { %90 = vadd.xlane.f32.xlu0 %v85_v29  ;;  %v162_v54 = vmul.f32 %v159_v49, %v322_v4  ;;  %v163_v57 = vmul.f32 %v158_v45, %v319_v3 }
  0x22   :  { %88 = vadd.xlane.f32.xlu1 %v84_v28  ;;  %v186_v55 = vsel %vm53_vm0, %v183_v52, %v181_v50  ;;  %v184_v56 = vsel %vm53_vm0, %v182_v51, %v183_v52  ;;  %v185_v60 = vsel %vm53_vm0, %v181_v50, %v182_v51 }
  0x23   :  { %v187_v58 = vmul.f32 %v186_v55, %v317_v2  ;;  %v207_v59 = vrot.slane %v186_v55, 7  ;;  %v209_v61 = vrot.slane %v184_v56, 7  ;;  %v208_v62 = vrot.slane %v185_v60, 7 }
  0x24   :  { %v188_v63 = vmul.f32 %v185_v60, %v322_v4  ;;  %v189_v5 = vmul.f32 %v184_v56, %v319_v3 }
  0x25   :  { %114 = vadd.xlane.f32.xlu0 %v110_v36  ;;  %v212_v6 = vsel %vm53_vm0, %v209_v61, %v207_v59  ;;  %v211_v7 = vsel %vm53_vm0, %v207_v59, %v208_v62  ;;  %v210_v10 = vsel %vm53_vm0, %v208_v62, %v209_v61 }
  0x26   :  { %112 = vadd.xlane.f32.xlu1 %v109_v35  ;;  %v213_v8 = vmul.f32 %v212_v6, %v317_v2  ;;  %v214_v9 = vmul.f32 %v211_v7, %v322_v4  ;;  %v215_v11 = vmul.f32 %v210_v10, %v319_v3 }
  0x29   :  { %138 = vadd.xlane.f32.xlu0 %v135_v42 }
  0x2a   :  { %116 = vadd.xlane.f32.xlu1 %v111_v41 }
  0x2d   :  { %142 = vadd.xlane.f32.xlu0 %v137_v47 }
  0x2e   :  { %140 = vadd.xlane.f32.xlu1 %v136_v46 }
  0x31   :  { %166 = vadd.xlane.f32.xlu0 %v162_v54 }
  0x32   :  { %164 = vadd.xlane.f32.xlu1 %v161_v53 }
  0x35   :  { %190 = vadd.xlane.f32.xlu0 %v187_v58 }
  0x36   :  { %168 = vadd.xlane.f32.xlu1 %v163_v57 }
  0x39   :  { %194 = vadd.xlane.f32.xlu0 %v189_v5  ;;  %v27_v5 = vand.u32 127, %v26_v0 }
  0x3a   :  { %192 = vadd.xlane.f32.xlu1 %v188_v63 }
  0x3b   :  { %vm74_vm1 = vcmp.eq.s32.totalorder %v27_v5, 1  ;;  %vm45_vm2 = vcmp.eq.s32.totalorder %v27_v5, 0  ;;  %vm100_vm3 = vcmp.eq.s32.totalorder %v27_v5, 2  ;;  %vm126_vm4 = vcmp.eq.s32.totalorder %v27_v5, 3 }
  0x3c   :  { %vm152_vm5 = vcmp.eq.s32.totalorder %v27_v5, 4  ;;  %vm178_vm6 = vcmp.eq.s32.totalorder %v27_v5, 5  ;;  %vm204_vm7 = vcmp.eq.s32.totalorder %v27_v5, 6  ;;  %vm230_vm8 = vcmp.eq.s32.totalorder %v27_v5, 7 }
  0x3d   :  { %218 = vadd.xlane.f32.xlu0 %v214_v9 }
  0x3e   :  { %216 = vadd.xlane.f32.xlu1 %v213_v8 }
  0x42   :  { %220 = vadd.xlane.f32.xlu1 %v215_v11 }
  0x9a   :  { %v32_v12 = vpop.xlane.xlu0 %31 }
  0x9e   :  { %v34_v14 = vpop.xlane.xlu0 %33 }
  0x9f   :  { %v61_v13 = vpop.xlane.xlu1 %60  ;;  %v37_v4 = vadd.f32 %v34_v14, %v32_v12 }
  0xa2   :  { %v36_v16 = vpop.xlane.xlu0 %35 }
  0xa3   :  { %v63_v15 = vpop.xlane.xlu1 %62  ;;  %v38_v24 = vadd.f32 %v37_v4, %v36_v16 }
  0xa4   :  { %v66_v20 = vadd.f32 %v63_v15, %v61_v13 }
  0xa5   :  { %v39_v30 = vrot.slane %v38_v24, 4 }
  0xa6   :  { %v87_v18 = vpop.xlane.xlu0 %86 }
  0xa7   :  { %v65_v17 = vpop.xlane.xlu1 %64  ;;  %v40_v37 = vadd.f32 %v39_v30, %v38_v24 }
  0xa8   :  { %v67_v22 = vadd.f32 %v66_v20, %v65_v17 }
  0xa9   :  { %v41_v45 = vrot.slane %v40_v37, 2 }
  0xaa   :  { %v91_v2 = vpop.xlane.xlu0 %90  ;;  %v68_v26 = vrot.slane %v67_v22, 4 }
  0xab   :  { %v89_v19 = vpop.xlane.xlu1 %88  ;;  %v42_v54 = vadd.f32 %v41_v45, %v40_v37 }
  0xac   :  { %v92_v21 = vadd.f32 %v89_v19, %v87_v18  ;;  %v69_v32 = vadd.f32 %v68_v26, %v67_v22 }
  0xad   :  { %v43_v6 = vrot.slane %v42_v54, 1 }
  0xae   :  { %v115_v23 = vpop.xlane.xlu0 %114  ;;  %v93_v3 = vadd.f32 %v92_v21, %v91_v2  ;;  %v70_v40 = vrot.slane %v69_v32, 2 }
  0xaf   :  { %v113_v1 = vpop.xlane.xlu1 %112  ;;  %v44_v17 = vadd.f32 %v43_v6, %v42_v54 }
  0xb0   :  { %v118_v25 = vadd.f32 %v115_v23, %v113_v1  ;;  %v94_v31 = vrot.slane %v93_v3, 4  ;;  %v71_v49 = vadd.f32 %v70_v40, %v69_v32 }
  0xb1   :  { %v46_v24 = vsel %vm45_vm2, %v44_v17, 0.0 }
  0xb2   :  { %v139_v29 = vpop.xlane.xlu0 %138  ;;  %v95_v38 = vadd.f32 %v94_v31, %v93_v3  ;;  %v72_v58 = vrot.slane %v71_v49, 1 }
  0xb3   :  { %v117_v27 = vpop.xlane.xlu1 %116 }
  0xb4   :  { %v119_v28 = vadd.f32 %v118_v25, %v117_v27  ;;  %v96_v47 = vrot.slane %v95_v38, 2  ;;  %v73_v11 = vadd.f32 %v72_v58, %v71_v49 }
  0xb6   :  { %v120_v34 = vrot.slane %v119_v28, 4  ;;  %v143_v36 = vpop.xlane.xlu0 %142  ;;  %v97_v55 = vadd.f32 %v96_v47, %v95_v38  ;;  %v75_v21 = vsel %vm74_vm1, %v73_v11, 0.0 }
  0xb7   :  { %v141_v33 = vpop.xlane.xlu1 %140 }
  0xb8   :  { %v144_v35 = vadd.f32 %v141_v33, %v139_v29  ;;  %v121_v42 = vadd.f32 %v120_v34, %v119_v28  ;;  %v98_v7 = vrot.slane %v97_v55, 1  ;;  %v76_v28 = vadd.f32 %v75_v21, %v46_v24 }
  0xba   :  { %v145_v39 = vadd.f32 %v144_v35, %v143_v36  ;;  %v167_v44 = vpop.xlane.xlu0 %166  ;;  %v122_v51 = vrot.slane %v121_v42, 2  ;;  %v99_v19 = vadd.f32 %v98_v7, %v97_v55 }
  0xbb   :  { %v165_v41 = vpop.xlane.xlu1 %164 }
  0xbc   :  { %v146_v43 = vrot.slane %v145_v39, 4  ;;  %v170_v46 = vadd.f32 %v167_v44, %v165_v41  ;;  %v123_v60 = vadd.f32 %v122_v51, %v121_v42  ;;  %v101_v25 = vsel %vm100_vm3, %v99_v19, 0.0 }
  0xbd   :  { %v102_v33 = vadd.f32 %v101_v25, %v76_v28 }
  0xbe   :  { %v147_v48 = vadd.f32 %v146_v43, %v145_v39  ;;  %v191_v53 = vpop.xlane.xlu0 %190  ;;  %v124_v13 = vrot.slane %v123_v60, 1 }
  0xbf   :  { %v169_v50 = vpop.xlane.xlu1 %168 }
  0xc0   :  { %v171_v52 = vadd.f32 %v170_v46, %v169_v50  ;;  %v148_v56 = vrot.slane %v147_v48, 2  ;;  %v125_v4 = vadd.f32 %v124_v13, %v123_v60 }
  0xc2   :  { %v172_v57 = vrot.slane %v171_v52, 4  ;;  %v195_v63 = vpop.xlane.xlu0 %194  ;;  %v149_v8 = vadd.f32 %v148_v56, %v147_v48  ;;  %v127_v29 = vsel %vm126_vm4, %v125_v4, 0.0 }
  0xc3   :  { %v193_v59 = vpop.xlane.xlu1 %192  ;;  %v128_v37 = vadd.f32 %v127_v29, %v102_v33 }
  0xc4   :  { %v173_v61 = vadd.f32 %v172_v57, %v171_v52  ;;  %v196_v62 = vadd.f32 %v193_v59, %v191_v53  ;;  %v150_v2 = vrot.slane %v149_v8, 1 }
  0xc6   :  { %v174_v9 = vrot.slane %v173_v61, 2  ;;  %v197_v10 = vadd.f32 %v196_v62, %v195_v63  ;;  %v219_v16 = vpop.xlane.xlu0 %218  ;;  %v151_v3 = vadd.f32 %v150_v2, %v149_v8 }
  0xc7   :  { %v217_v12 = vpop.xlane.xlu1 %216 }
  0xc8   :  { %v175_v14 = vadd.f32 %v174_v9, %v173_v61  ;;  %v198_v15 = vrot.slane %v197_v10, 4  ;;  %v222_v18 = vadd.f32 %v219_v16, %v217_v12  ;;  %v153_v34 = vsel %vm152_vm5, %v151_v3, 0.0 }
  0xc9   :  { %v154_v40 = vadd.f32 %v153_v34, %v128_v37 }
  0xca   :  { %v199_v20 = vadd.f32 %v198_v15, %v197_v10  ;;  %v176_v22 = vrot.slane %v175_v14, 1 }
  0xcb   :  { %v221_v0 = vpop.xlane.xlu1 %220 }
  0xcc   :  { %v200_v1 = vrot.slane %v199_v20, 2  ;;  %v223_v23 = vadd.f32 %v222_v18, %v221_v0  ;;  %v177_v30 = vadd.f32 %v176_v22, %v175_v14 }
  0xce   :  { %v201_v26 = vadd.f32 %v200_v1, %v199_v20  ;;  %v224_v27 = vrot.slane %v223_v23, 4  ;;  %v179_v38 = vsel %vm178_vm6, %v177_v30, 0.0 }
  0xcf   :  { %v180_v43 = vadd.f32 %v179_v38, %v154_v40 }
  0xd0   :  { %v202_v31 = vrot.slane %v201_v26, 1  ;;  %v225_v32 = vadd.f32 %v224_v27, %v223_v23 }
  0xd2   :  { %v203_v35 = vadd.f32 %v202_v31, %v201_v26  ;;  %v226_v36 = vrot.slane %v225_v32, 2 }
  0xd4   :  { %v227_v39 = vadd.f32 %v226_v36, %v225_v32  ;;  %v205_v42 = vsel %vm204_vm7, %v203_v35, 0.0 }
  0xd5   :  { %v206_v45 = vadd.f32 %v205_v42, %v180_v43 }
  0xd6   :  { %v228_v41 = vrot.slane %v227_v39, 1 }
  0xd8   :  { %v229_v44 = vadd.f32 %v228_v41, %v227_v39 }
  0xda   :  { %v231_v46 = vsel %vm230_vm8, %v229_v44, 0.0 }
  0xdb   :  { %v232_v47 = vadd.f32 %v231_v46, %v206_v45 }
  0xdd   :  { %233 = vst [vmem:[#allocation5] sm:$0x1] %v232_v47 }
  0xde   :  { %284 = shalt.err (!%p281_p9)
}
  0xdf   :  { %243 = dma.vmem_to_hbm [thread:$0]  %s241_s13, 16, %s401_s1, [#allocation4]  }
  0xe0   :  { %295 = dma.done.wait [#allocation4], 16  }
  0xe1   :  { %296 = vsyncadd [#allocation4], 4294967280 }
  0xe2   :  { %247 = vsyncpa [#allocation3], 1 }
  0xe3   :  { %248 = vsyncpa [#allocation4], 1 }

</bundles_post_ra>
